<compile_context>
chip_gen: v7x
topology: tpu7x:2x2x1
jax: 0.10.0
libtpu: 0.0.40
codegen_flags: <defaults>
</compile_context>

<pallas_src>
import functools

import jax
import jax.numpy as jnp
from jax import lax
from jax.experimental import pallas as pl
from jax.experimental.pallas import tpu as pltpu

_HIGH = jax.lax.Precision.HIGHEST
_SIZES = (8, 16, 32)   # per-GenBlock output spatial size (out_size=32 config)
_BOTTOM = 4            # bottom spatial size


# ------------------------------ Pallas kernel -------------------------------

def _make_taps(hw, p, roll_fwd):
    """Per-tap (lane-roll amount, boundary mask) for a 3x3 'same' conv at size hw.

    Built once per spatial size and reused by every conv at that size (masks
    hoisted out of the conv calls, per review).
    """
    lane = lax.broadcasted_iota(jnp.int32, (1, p), 1)
    row, col = lane // hw, lane % hw
    taps = []
    for a in (-1, 0, 1):
        for b in (-1, 0, 1):
            s = a * hw + b
            if s == 0:
                k = 0
            else:
                k = (-s) % p if roll_fwd else s % p
            valid = ((row + a >= 0) & (row + a < hw) &
                     (col + b >= 0) & (col + b < hw))
            taps.append((k, valid))
    return taps


def _conv3x3_cm(x, wmat, bias, taps):
    """3x3 'same' cross-correlation on a channel-major activation.

    x:    (Cin, P) f32    spatial flattened row-major onto lanes (extra lanes
                          beyond hw*hw are dead padding).
    wmat: (Cout, 9*Cin)   bf16, K ordered as (kh, kw, cin).
    bias: (Cout, 1) f32
    taps: list of 9 (roll_amount, (1, P) bool mask).

    Rolls/masks run in f32 (VPU-native on all generations); each masked patch is
    cast to bf16 so the single im2col matmul uses bf16 MXU operands with f32
    accumulation.
    """
    patches = []
    for k, valid in taps:
        shifted = x if k == 0 else pltpu.roll(x, shift=k, axis=1)   # XLU rotation
        patches.append(jnp.where(valid, shifted, 0.0).astype(jnp.bfloat16))
    patch_mat = jnp.concatenate(patches, axis=0)          # (9*Cin, P) bf16 im2col
    return jnp.dot(wmat, patch_mat,
                   preferred_element_type=jnp.float32) + bias


def _decoder_kernel(act0_ref, s1_ref, s2_ref, s3_ref,
                    w0_ref, w1_ref, b1_ref, w2_ref, b2_ref,
                    w5_ref, b5_ref, out_ref, *, sizes, roll_fwd):
    bf16 = jnp.bfloat16
    x = act0_ref[0]                                       # (C, bottom*bottom) f32
    c = x.shape[0]
    s_refs = (s1_ref, s2_ref, s3_ref)

    taps_by_hw = {}
    for i, hw in enumerate(sizes):                        # GenBlock i
        p_out = s_refs[i].shape[1]
        if hw not in taps_by_hw:
            taps_by_hw[hw] = _make_taps(hw, p_out, roll_fwd)
        taps = taps_by_hw[hw]

        # Fused nearest-2x upsample + 1x1 skip (review: skip-fold, ReLU@P_in):
        #   main input = relu(x) upsampled; skip = (W0 @ x) upsampled.
        # Both share a single (2C, P_in) @ (P_in, P_out) bf16 MXU dot.  The
        # upsample matrix has zero rows for dead (lane-padded) input lanes, so
        # garbage from the previous stage's padding is annihilated here.
        xr = jnp.maximum(x, 0.0)                                     # (C, P_in) f32
        w0x = jnp.dot(w0_ref[i], x.astype(bf16),
                      preferred_element_type=jnp.float32)            # (C, P_in) f32
        z_b = jnp.concatenate([xr, w0x], axis=0).astype(bf16)        # (2C, P_in)
        up = jnp.dot(z_b, s_refs[i][...],
                     preferred_element_type=jnp.float32)             # (2C, P_out)

        # main path: conv2d1 (+ReLU from make_conv_block), conv2d2
        h = _conv3x3_cm(up[:c], w1_ref[i], b1_ref[i], taps)
        h = _conv3x3_cm(jnp.maximum(h, 0.0), w2_ref[i], b2_ref[i], taps)
        # skip bias b0 is folded into b2 host-side -> plain residual add.
        x = h + up[c:]

    # bn4 = Identity, ReLU, conv2d5 (reuses the hw=32 masks)
    y = _conv3x3_cm(jnp.maximum(x, 0.0), w5_ref[...], b5_ref[...],
                    taps_by_hw[sizes[-1]])
    out_ref[0] = y                                        # (out_ch, 32*32), lane-dense


# ------------------------- host-side weight packing --------------------------

def _deconv3x3_to_mat(w):
    # ConvTranspose2d(k=3, stride=1, padding=1) weight (Cin, Cout, 3, 3) ->
    # (Cout, 9*Cin) matrix of the equivalent cross-correlation, K = (kh, kw, cin).
    cin, cout = w.shape[0], w.shape[1]
    return jnp.transpose(w[:, :, ::-1, ::-1], (1, 2, 3, 0)).reshape(cout, 9 * cin)


def _upsample_matrix(h_in, p_in_phys, p_out_phys):
    # 0/1 matrix S with (x_flat @ S) == flatten(nearest_upsample_2x(unflatten(x))).
    # Zero-padded rows/cols handle the lane-padded (>=128) physical layout.
    w_in, w_out = h_in, 2 * h_in
    p_in, p_out = h_in * w_in, (2 * h_in) * w_out
    q = jnp.arange(p_out)
    src = (q // w_out // 2) * w_in + (q % w_out) // 2
    s = (jnp.arange(p_in)[:, None] == src[None, :]).astype(jnp.float32)
    return jnp.pad(s, ((0, p_in_phys - p_in), (0, p_out_phys - p_out)))


def pack_decoder_operands(params):
    """Precompute every effective weight once; MXU operands stored in bf16.

    The 0/1 upsample matrices and weight magnitudes are well within bf16 range;
    biases stay f32 (added after f32 accumulation).  The 1x1-skip bias b0 is
    folded into the conv2 bias (both are per-channel constants added to the
    block output), removing one bias add per block in-kernel.
    """
    blocks = params['blocks']
    bf16 = jnp.bfloat16
    p_phys = [max(s * s, 128) for s in _SIZES]
    p_in_phys = [_BOTTOM * _BOTTOM] + p_phys[:-1]
    return {
        'lin_w': params['linear_w'],
        'lin_b': params['linear_b'],
        'w0': jnp.stack([b['w0'][:, :, 0, 0].T for b in blocks]).astype(bf16),
        'w1': jnp.stack([_deconv3x3_to_mat(b['w1']) for b in blocks]).astype(bf16),
        'b1': jnp.stack([b['b1'][:, None] for b in blocks]),
        'w2': jnp.stack([_deconv3x3_to_mat(b['w2']) for b in blocks]).astype(bf16),
        'b2': jnp.stack([(b['b2'] + b['b0'])[:, None] for b in blocks]),  # b0 folded
        'w5': _deconv3x3_to_mat(params['conv5_w']).astype(bf16),
        'b5': params['conv5_b'][:, None],
        's1': _upsample_matrix(_SIZES[0] // 2, p_in_phys[0], p_phys[0]).astype(bf16),
        's2': _upsample_matrix(_SIZES[1] // 2, p_in_phys[1], p_phys[1]).astype(bf16),
        's3': _upsample_matrix(_SIZES[2] // 2, p_in_phys[2], p_phys[2]).astype(bf16),
    }


# ------------------------------ forward wrapper ------------------------------

def resnet_decoder_forward(z, ops, *, roll_fwd):
    n = z.shape[0]
    c = ops['w0'].shape[2]
    out_ch = ops['w5'].shape[0]
    p0 = ops['s1'].shape[0]
    p_out = _SIZES[-1] * _SIZES[-1]

    # linear0 + view(-1, C, bottom, bottom): a (N,16)x(16,256) GEMM -- left to XLA
    # (too small to be worth a kernel); the reshape lands directly in the kernel's
    # channel-major (C, bottom*bottom) layout.
    act0 = (jnp.dot(z, ops['lin_w'], precision=_HIGH) + ops['lin_b']).reshape(n, c, p0)

    kern = functools.partial(_decoder_kernel, sizes=_SIZES, roll_fwd=roll_fwd)
    const3 = lambda i: (0, 0, 0)
    const2 = lambda i: (0, 0)
    out = pl.pallas_call(
        kern,
        out_shape=jax.ShapeDtypeStruct((n, out_ch, p_out), jnp.float32),
        grid=(n,),
        in_specs=[
            pl.BlockSpec((1, c, p0), lambda i: (i, 0, 0)),
            pl.BlockSpec(ops['s1'].shape, const2),
            pl.BlockSpec(ops['s2'].shape, const2),
            pl.BlockSpec(ops['s3'].shape, const2),
            pl.BlockSpec(ops['w0'].shape, const3),
            pl.BlockSpec(ops['w1'].shape, const3),
            pl.BlockSpec(ops['b1'].shape, const3),
            pl.BlockSpec(ops['w2'].shape, const3),
            pl.BlockSpec(ops['b2'].shape, const3),
            pl.BlockSpec(ops['w5'].shape, const2),
            pl.BlockSpec(ops['b5'].shape, const2),
        ],
        out_specs=pl.BlockSpec((1, out_ch, p_out), lambda i: (i, 0, 0)),
        compiler_params=pltpu.CompilerParams(dimension_semantics=("parallel",)),
    )(act0, ops['s1'], ops['s2'], ops['s3'],
      ops['w0'], ops['w1'], ops['b1'], ops['w2'], ops['b2'],
      ops['w5'], ops['b5'])
    # (N, out_ch, 32*32) channel-major == NCHW flattened -> just unflatten H, W.
    return out.reshape(n, out_ch, _SIZES[-1], _SIZES[-1])


# -------------------- one-time hardware-convention probe ---------------------

def _detect_roll_direction():
    """True iff pltpu.roll follows jnp.roll's convention (result[i] = x[i-shift]).

    Retained on purpose (review noted it as merely redundant, not wrong): a
    single 8x128 probe compile at startup guarantees the tap-shift sign on any
    toolchain and has zero steady-state cost.
    """
    x = jnp.arange(8 * 128, dtype=jnp.float32).reshape(8, 128)

    def kern(x_ref, o_ref):
        o_ref[...] = pltpu.roll(x_ref[...], shift=1, axis=1)

    y = pl.pallas_call(
        kern,
        out_shape=jax.ShapeDtypeStruct((8, 128), jnp.float32),
        grid=(1,),
        in_specs=[pl.BlockSpec((8, 128), lambda i: (0, 0))],
        out_specs=pl.BlockSpec((8, 128), lambda i: (0, 0)),
    )(x)
    return bool(jnp.array_equal(y, jnp.roll(x, 1, axis=1)))


# ------------------------------- param init ----------------------------------

def init_params(key, z_dim, out_channels, width):
    # out_size=32 config: in_dims = out_dims = [4w, 4w, 4w], bottom = 4
    c = 4 * width
    in_dims, out_dims, bottom = [c, c, c], [c, c, c], _BOTTOM
    kit = iter(jax.random.split(key, 64))

    def nrm(shape, fan_in):
        return (jax.random.normal(next(kit), shape, jnp.float32)
                / jnp.sqrt(jnp.float32(fan_in)))

    params = {}
    d0 = in_dims[0] * bottom * bottom
    params['linear_w'] = nrm((z_dim, d0), z_dim)          # (in, out) layout
    params['linear_b'] = 0.1 * nrm((d0,), 1.0)
    blocks = []
    for ci, co in zip(in_dims, out_dims):
        blocks.append({
            # ConvTranspose2d weights kept in PyTorch (Cin, Cout, kH, kW) layout
            'w0': nrm((ci, co, 1, 1), ci), 'b0': 0.1 * nrm((co,), 1.0),
            'w1': nrm((ci, co, 3, 3), ci * 9), 'b1': 0.1 * nrm((co,), 1.0),
            'w2': nrm((co, co, 3, 3), co * 9), 'b2': 0.1 * nrm((co,), 1.0),
        })
    params['blocks'] = blocks
    params['conv5_w'] = nrm((out_dims[-1], out_channels, 3, 3), out_dims[-1] * 9)
    params['conv5_b'] = 0.1 * nrm((out_channels,), 1.0)
    return params, (in_dims, out_dims, bottom)


# --------------------------- plain-JAX reference -----------------------------

def convtranspose_to_hwio(w):
    # ConvTranspose2d weight (Cin, Cout, kH, kW) -> equivalent cross-correlation
    # weight in HWIO (flip spatial dims, swap channel axes); exact for stride 1.
    return jnp.transpose(w, (2, 3, 0, 1))[::-1, ::-1]


def upsample2x_nhwc(x):
    # F.interpolate(scale_factor=2, mode='nearest'): out[i] = in[i // 2]
    n, h, w, c = x.shape
    x = jnp.broadcast_to(x[:, :, None, :, None, :], (n, h, 2, w, 2, c))
    return x.reshape(n, 2 * h, 2 * w, c)


def _ref_conv3x3(x, w_eff, b):
    y = lax.conv_general_dilated(x, w_eff, (1, 1), 'SAME',
                                 dimension_numbers=('NHWC', 'HWIO', 'NHWC'),
                                 precision=_HIGH)
    return y + b.reshape(1, 1, 1, -1)


def ref_forward(z, params, config):
    in_dims, _, bottom = config
    n = z.shape[0]
    act = jnp.dot(z, params['linear_w'], precision=_HIGH) + params['linear_b']
    act = act.reshape(n, in_dims[0], bottom, bottom).transpose(0, 2, 3, 1)
    for blk in params['blocks']:
        x = upsample2x_nhwc(jnp.maximum(act, 0.0))
        x = jnp.maximum(_ref_conv3x3(x, convtranspose_to_hwio(blk['w1']), blk['b1']), 0.0)
        x = _ref_conv3x3(x, convtranspose_to_hwio(blk['w2']), blk['b2'])
        x0 = upsample2x_nhwc(act)
        x0 = jnp.einsum('nhwc,cd->nhwd', x0, blk['w0'][:, :, 0, 0],
                        precision=_HIGH) + blk['b0'].reshape(1, 1, 1, -1)
        act = x + x0
    act = jnp.maximum(act, 0.0)
    act = _ref_conv3x3(act, convtranspose_to_hwio(params['conv5_w']), params['conv5_b'])
    return act.transpose(0, 3, 1, 2)


if __name__ == "__main__":
    key = jax.random.PRNGKey(0)
    width, z_dim, out_channels, batch = 4, 16, 3, 2
    pkey, zkey = jax.random.split(key)
    params, config = init_params(pkey, z_dim, out_channels, width)
    z = jax.random.normal(zkey, (batch, z_dim), jnp.float32)

    ops = pack_decoder_operands(params)          # effective bf16 weights, built once
    roll_fwd = _detect_roll_direction()          # one-time HW-convention probe

    forward = jax.jit(functools.partial(resnet_decoder_forward, roll_fwd=roll_fwd))
    out = jax.block_until_ready(forward(z, ops))
    assert out.shape == (batch, out_channels, 32, 32), out.shape

    ref = ref_forward(z, params, config)
    # bf16-derived tolerance (fixed, no auto-relax probe): each MXU operand is
    # rounded to an 8-bit mantissa (~2^-9 relative).  ~7 cascaded K=144 dots with
    # O(1)-scale activations give a typical elementwise error ~1e-2 and a tail of
    # a few e-2 over the 6144 outputs.  A structural bug (wrong tap/mask/packing)
    # produces O(1) errors, >10x above both bounds.
    diff = jnp.abs(out - ref)
    mean_err = float(jnp.mean(diff))
    max_viol = float(jnp.max(diff - (7.5e-2 + 4e-2 * jnp.abs(ref))))
    assert mean_err < 2e-2, f"mean |err| vs reference too large: {mean_err}"
    assert max_viol <= 0.0, f"elementwise error above bf16-derived bound by {max_viol}"

    print("KERNEL_OK")
</pallas_src>

<mosaic_0001>
module attributes {stable_mosaic.version = 11 : i64} {
  func.func @kern(%arg0: i32, %arg1: memref<8x128xf32, #tpu.memory_space<vmem>>, %arg2: memref<8x128xf32, #tpu.memory_space<vmem>>) attributes {dimension_semantics = [#tpu.dimension_semantics<arbitrary>], iteration_bounds = array<i64: 1>, scalar_prefetch = 0 : i64, scratch_operands = 0 : i64, tpu.core_type = #tpu.core_type<tc>, window_params = [{pipeline_mode = #tpu.pipeline_mode<synchronous>, transform_indices = @transform_0, window_bounds = array<i64: 8, 128>}, {pipeline_mode = #tpu.pipeline_mode<synchronous>, transform_indices = @transform_1, window_bounds = array<i64: 8, 128>}]} {
    %c0 = arith.constant 0 : index
    %c0_0 = arith.constant 0 : index
    %0 = vector.load %arg1[%c0, %c0_0] : memref<8x128xf32, #tpu.memory_space<vmem>>, vector<8x128xf32>
    %c1_i32 = arith.constant 1 : i32
    %1 = tpu.dynamic_rotate %0 by %c1_i32 dim 1 : vector<8x128xf32>, i32 -> vector<8x128xf32>
    %c0_1 = arith.constant 0 : index
    %c0_2 = arith.constant 0 : index
    %2 = vector.load %arg2[%c0_1, %c0_2] : memref<8x128xf32, #tpu.memory_space<vmem>>, vector<8x128xf32>
    tpu.vector_store %arg2[%c0_1, %c0_2], %1 {strides = array<i32>} : memref<8x128xf32, #tpu.memory_space<vmem>>, vector<8x128xf32>,
    return
  }
  func.func @transform_0(%arg0: i32) -> (i32, i32) {
    %c0_i32 = arith.constant 0 : i32
    %c0_i32_0 = arith.constant 0 : i32
    %c0_i32_1 = arith.constant 0 : i32
    return %c0_i32, %c0_i32_0 : i32, i32
  }
  func.func @transform_1(%arg0: i32) -> (i32, i32) {
    %c0_i32 = arith.constant 0 : i32
    %c0_i32_0 = arith.constant 0 : i32
    %c0_i32_1 = arith.constant 0 : i32
    return %c0_i32, %c0_i32_0 : i32, i32
  }
}

</mosaic_0001>

<bundles_post_ra>
// kernel: tpu_custom_call.1
= control target key start
LH: loop header
LB: loop body
LE: loop exit
PB: predicated region body
PF: predicated region fallthrough
CT: control target
= control target key end

     0   :  { %6 = vsyncpa [#allocation3], 0  ;;  %s128_s0 = inlined_call_operand.hbm [shape: f32[8,128], index: 0, kind: input, shape index: {}]   ;;  %s129_s1 = inlined_call_operand.hbm [shape: f32[8,128], index: 1, kind: output, shape index: {}]  }
   0x1   :  { %7 = vsyncpa [#allocation4], 0  ;;  %s91_s6 = smov [#allocation2]   ;;  %s43_s10 = scalar_lea.hbm %s128_s0, 128 }
   0x2   :  { %s14_s7 = sshll.u32 %s91_s6, 4  ;;  %p44_p0 = scmp.ne.s32.totalorder %s128_s0, %s43_s10  ;;  %s15_s7 = int_to_ptr.vmem [resolvable:$true] %s14_s7 }
   0x3   :  { %p47_p1 = scmp.lt.u32.totalorder %s43_s10, %s128_s0 }
   0x5   :  { %p49_p2 = pnand %p47_p1, %p44_p0 }
   0x7   :  { %52 = shalt.err (!%p49_p2)
}
   0x8   :  { %s53_s15 = scalar_lea.vmem %s15_s7, 128  ;;  %p58_p4 = scmp.lt.s32.totalorder %s15_s7, %s15_s7 }
   0x9   :  { %p54_p3 = scmp.ne.s32.totalorder %s15_s7, %s53_s15  ;;  %p59_p5 = scmp.lt.s32.totalorder %s53_s15, %s53_s15 }
   0xb   :  { %p60_p6 = por %p59_p5, %p58_p4 }
   0xd   :  { %p61_p7 = pnand %p60_p6, %p54_p3 }
   0xf   :  { %64 = shalt.err (!%p61_p7)
}
  0x10   :  { %17 = dma.hbm_to_vmem [thread:$0]  %s128_s0, 128, %s15_s7, [#allocation3]  }
  0x11   :  { %87 = dma.done.wait [#allocation3], 128  }
  0x12   :  { %88 = vsyncadd [#allocation3], 4294967168  ;;  %v21_v0 = vld [vmem:[#allocation2] sm:$0xff]  ;;  %s92_s18 = smov 1   ;;  %s93_s19 = smov [#allocation5]  }
  0x13   :  { %22 = vrot.lane.b32.xlu0 %v21_v0, %s92_s18  ;;  %s31_s20 = sshll.u32 %s93_s19, 4  ;;  %s32_s20 = int_to_ptr.vmem [resolvable:$true] %s31_s20 }
  0x14   :  { %s65_s21 = scalar_lea.vmem %s32_s20, 128  ;;  %p70_p9 = scmp.lt.s32.totalorder %s32_s20, %s32_s20 }
  0x15   :  { %p66_p8 = scmp.ne.s32.totalorder %s32_s20, %s65_s21  ;;  %p71_p10 = scmp.lt.s32.totalorder %s65_s21, %s65_s21 }
  0x17   :  { %p72_p11 = por %p71_p10, %p70_p9 }
  0x19   :  { %p73_p12 = pnand %p72_p11, %p66_p8 }
  0x85   :  { %v23_v1 = vpop.permute.xlu0 %22 }
  0x86   :  { %24 = vst [vmem:[#allocation5] sm:$0xff] %v23_v1 }
  0x87   :  { %76 = shalt.err (!%p73_p12)
}
  0x88   :  { %s77_s0 = scalar_lea.hbm %s129_s1, 128 }
  0x89   :  { %p78_p13 = scmp.ne.s32.totalorder %s129_s1, %s77_s0  ;;  %p81_p0 = scmp.lt.u32.totalorder %s77_s0, %s129_s1 }
  0x8b   :  { %p83_p1 = pnand %p81_p0, %p78_p13 }
  0x8d   :  { %86 = shalt.err (!%p83_p1)
}
  0x8e   :  { %34 = dma.vmem_to_hbm [thread:$0]  %s32_s20, 128, %s129_s1, [#allocation4]  }
  0x8f   :  { %89 = dma.done.wait [#allocation4], 128  }
  0x90   :  { %90 = vsyncadd [#allocation4], 4294967168 }
  0x91   :  { %38 = vsyncpa [#allocation3], 1 }
  0x92   :  { %39 = vsyncpa [#allocation4], 1 }

</bundles_post_ra>
